<compile_context>
chip_gen: v5e
topology: v5e:2x2
jax: 0.10.0
libtpu: 0.0.40
codegen_flags: <defaults>
</compile_context>

<pallas_src>
import jax
import jax.numpy as jnp
from jax.experimental import pallas as pl
from jax.experimental.pallas import tpu as pltpu


_PALLAS_MIN_N = 512  # below this, plain (fusable) XLA beats a pallas_call launch


# ---------------------------------------------------------------------------
# Kernel: zero the main diagonal of one diagonal tile.
# Only ever invoked on block (i, i), so the tile's local diagonal coincides
# with the global diagonal (row origin == col origin).  The iota/compare/
# select is pure VPU filler fully hidden under the tile DMA.
# ---------------------------------------------------------------------------
def _zero_diag_tile_kernel(g_ref, o_ref):
    g = g_ref[...]
    rows = jax.lax.broadcasted_iota(jnp.int32, g.shape, 0)
    cols = jax.lax.broadcasted_iota(jnp.int32, g.shape, 1)
    o_ref[...] = jnp.where(rows == cols, jnp.zeros_like(g), g)


def _pick_diag_tile(n: int, dtype) -> int:
    """Generation/dtype-aware square tile edge (multiple of 128)."""
    try:
        kind = jax.devices()[0].device_kind.lower()
    except Exception:  # pragma: no cover - defensive
        kind = ""
    t = 512 if "v7" in kind else 256          # v7x HBM is fast enough that 256 is step-bound
    if jnp.dtype(dtype).itemsize <= 2:        # bf16/fp16/int8: same byte budget, bigger tile
        t = min(2 * t, 1024)
    t = min(t, (n // 128) * 128)              # don't exceed the matrix (n >= 128 here)
    return max(t, 128)


def _pallas_zero_diag(g):
    """Pallas path: touch only diagonal tiles; alias g -> output."""
    n = g.shape[0]

    if n < 128:
        # Tiny matrix: one whole-array block (block_shape == full array dims
        # satisfies the (8, 128) rule).  Cheap by construction.
        return pl.pallas_call(
            _zero_diag_tile_kernel,
            out_shape=jax.ShapeDtypeStruct(g.shape, g.dtype),
            grid=(1,),
            in_specs=[pl.BlockSpec(g.shape, lambda i: (0, 0))],
            out_specs=pl.BlockSpec(g.shape, lambda i: (0, 0)),
        )(g)

    t = _pick_diag_tile(n, g.dtype)
    steps = pl.cdiv(n, t)  # ragged last tile handled by partial-block masking
    itemsize = jnp.dtype(g.dtype).itemsize
    cost = pl.CostEstimate(
        flops=0,
        transcendentals=0,
        bytes_accessed=int(2 * steps * t * t * itemsize),
    )

    # Sparse diagonal-only grid: off-diagonal tiles are never visited, and
    # because the input is aliased to the output they are never DMA'd either.
    return pl.pallas_call(
        _zero_diag_tile_kernel,
        out_shape=jax.ShapeDtypeStruct(g.shape, g.dtype),
        grid=(steps,),
        in_specs=[pl.BlockSpec((t, t), lambda i: (i, i))],
        out_specs=pl.BlockSpec((t, t), lambda i: (i, i)),
        input_output_aliases={0: 0},
        compiler_params=pltpu.CompilerParams(
            dimension_semantics=("parallel",),
        ),
        cost_estimate=cost,
    )(g)


def _zero_diag_grad(g, *, force_pallas: bool = False):
    """Return g with its main diagonal zeroed (g is a square [N, N] matrix)."""
    # TODO(synk): batched (B, N, N) cotangents are not supported; the PyTorch
    # reference is itself 2-D-only (it indexes grad[range(n), range(n)]).
    assert g.ndim == 2 and g.shape[0] == g.shape[1], "expects a square matrix"
    n = g.shape[0]

    if not force_pallas and n < _PALLAS_MIN_N:
        # Small-N bypass: let XLA fuse the mask into neighboring backward ops.
        rows = jax.lax.broadcasted_iota(jnp.int32, g.shape, 0)
        cols = jax.lax.broadcasted_iota(jnp.int32, g.shape, 1)
        return jnp.where(rows == cols, jnp.zeros((), g.dtype), g)

    return _pallas_zero_diag(g)


# ---------------------------------------------------------------------------
# Module-equivalent callable (custom_vjp mirrors ZeroDiagonalFunction).
# ---------------------------------------------------------------------------
@jax.custom_vjp
def zero_diagonal_layer(x):
    # torch's `input_matrix.clone()` has no observable effect in JAX (arrays
    # are immutable): the forward is a pure identity, no kernel emitted.
    return x


def _fwd(x):
    return x, None


def _bwd(_, g):
    return (_zero_diag_grad(g),)


zero_diagonal_layer.defvjp(_fwd, _bwd)


if __name__ == "__main__":
    key = jax.random.PRNGKey(0)
    k_x, k_g, k_g2, k_g3 = jax.random.split(key, 4)

    # --- (1) main path: n >= 512 -> Pallas diagonal-tiled backward with a
    #         ragged last tile (cdiv grid) and aliased output. ------------
    n = 640
    x = jax.random.normal(k_x, (n, n), dtype=jnp.float32)

    y, vjp_fn = jax.vjp(zero_diagonal_layer, x)
    jax.block_until_ready(y)
    assert y.shape == x.shape and y.dtype == x.dtype
    assert bool(jnp.all(y == x))  # forward is an exact identity

    g_in = jax.random.normal(k_g, (n, n), dtype=jnp.float32)
    (g_out,) = vjp_fn(g_in)
    jax.block_until_ready(g_out)
    idx = jnp.arange(n)
    expected = g_in.at[idx, idx].set(0.0)
    assert bool(jnp.all(g_out[idx, idx] == 0.0))
    assert bool(jnp.allclose(g_out, expected))

    # --- (2) unaligned mid-size matrix forced through the tiled Pallas path
    #         (exercises cdiv grid + partial-block masking at 200 % 128 != 0).
    m = 200
    g2 = jax.random.normal(k_g2, (m, m), dtype=jnp.float32)
    g2_out = _zero_diag_grad(g2, force_pallas=True)
    jax.block_until_ready(g2_out)
    idx2 = jnp.arange(m)
    assert bool(jnp.allclose(g2_out, g2.at[idx2, idx2].set(0.0)))

    # --- (3) tiny matrix (< 128): whole-array-block Pallas path. ----------
    s = 48
    g3 = jax.random.normal(k_g3, (s, s), dtype=jnp.float32)
    g3_out = _zero_diag_grad(g3, force_pallas=True)
    jax.block_until_ready(g3_out)
    idx3 = jnp.arange(s)
    assert bool(jnp.allclose(g3_out, g3.at[idx3, idx3].set(0.0)))

    # --- (4) small-N XLA bypass (default path for n < 512). --------------
    g4_out = _zero_diag_grad(g3)
    jax.block_until_ready(g4_out)
    assert bool(jnp.allclose(g4_out, g3.at[idx3, idx3].set(0.0)))

    print("KERNEL_OK")
</pallas_src>

<mosaic_0001>
module attributes {stable_mosaic.version = 11 : i64} {
  func.func @_zero_diag_tile_kernel(%arg0: i32, %arg1: memref<256x256xf32, #tpu.memory_space<vmem>>, %arg2: memref<256x256xf32, #tpu.memory_space<vmem>>) attributes {dimension_semantics = [#tpu.dimension_semantics<parallel>], iteration_bounds = array<i64: 3>, scalar_prefetch = 0 : i64, scratch_operands = 0 : i64, tpu.core_type = #tpu.core_type<tc>, window_params = [{transform_indices = @transform_0, window_bounds = array<i64: 256, 256>}, {transform_indices = @transform_1, window_bounds = array<i64: 256, 256>}]} {
    %c0 = arith.constant 0 : index
    %c0_0 = arith.constant 0 : index
    %0 = vector.load %arg1[%c0, %c0_0] : memref<256x256xf32, #tpu.memory_space<vmem>>, vector<256x256xf32>
    %1 = tpu.iota {dimensions = array<i32: 0>} : vector<256x256xi32>
    %2 = tpu.iota {dimensions = array<i32: 1>} : vector<256x256xi32>
    %3 = arith.cmpi eq, %1, %2 : vector<256x256xi32>
    %cst = arith.constant 0.000000e+00 : f32
    %4 = vector.broadcast %cst : f32 to vector<256x256xf32>
    %5 = arith.select %3, %4, %0 : vector<256x256xi1>, vector<256x256xf32>
    %c0_1 = arith.constant 0 : index
    %c0_2 = arith.constant 0 : index
    %6 = vector.load %arg2[%c0_1, %c0_2] : memref<256x256xf32, #tpu.memory_space<vmem>>, vector<256x256xf32>
    tpu.vector_store %arg2[%c0_1, %c0_2], %5 {strides = array<i32>} : memref<256x256xf32, #tpu.memory_space<vmem>>, vector<256x256xf32>,
    return
  }
  func.func @transform_0(%arg0: i32) -> (i32, i32) {
    %c0_i32 = arith.constant 0 : i32
    return %arg0, %arg0 : i32, i32
  }
  func.func @transform_1(%arg0: i32) -> (i32, i32) {
    %c0_i32 = arith.constant 0 : i32
    return %arg0, %arg0 : i32, i32
  }
}

</mosaic_0001>

<bundles_post_ra>
// kernel: tpu_custom_call.1
= control target key start
LH: loop header
LB: loop body
LE: loop exit
PB: predicated region body
PF: predicated region fallthrough
CT: control target
= control target key end

     0   :  { %6 = vsyncpa [#allocation3], 0  ;;  %s1171_s0 = inlined_call_operand.hbm [shape: f32[640,640], index: 0, kind: input, shape index: {}, may-alias: {0,1}]   ;;  %s1172_s1 = inlined_call_operand.hbm [shape: f32[640,640], index: 1, kind: output, shape index: {}, may-alias: {0,1}]  }
   0x1   :  { %8 = vsyncpa [#allocation3 + $0x1], 0 }
   0x2   :  { %9 = vsyncpa [#allocation4], 0 }
   0x3   :  { %11 = vsyncpa [#allocation4 + $0x1], 0  ;;  %s781_s6 = smov 0   ;;  %s783_s7 = smov 0  }
   0x4   :  { %s785_s8 = smov 0   ;;  %s787_s9 = smov 0  }
   0x5 LB: > { %s802_s10 = sadd.s32 4294967295, %s763_s9   ;;  %s578_s11 = sadd.s32 4294967294, %s763_s9   ;;  %s763_s9 = sphi %s787_s9, %s1179_s9   ;;  %s759_s8 = sphi %s785_s8, %s1178_s8   ;;  %s755_s7 = sphi %s783_s7, %s1177_s7   ;;  %s751_s6 = sphi %s781_s6, %s1176_s6  }
   0x6   : > { %s806_s12 = sadd.s32 1, %s763_s9   ;;  %s26_s13 = sadd.s32 1, %s759_s8 }
   0x7   : > { %s21_s14 = ssub.s32 %s763_s9, %s806_s12  ;;  %p33_p0 = scmp.ne.s32.totalorder %s759_s8, %s755_s7 }
   0x8   : > { %s23_s15 = sor.u32 %s21_s14, %s21_s14  ;;  %p34_p1 = scmp.eq.s32.totalorder %s763_s9, 0 }
   0x9   : > { %p24_p2 = scmp.eq.s32.totalorder %s23_s15, 0  ;;  %p39_p3 = scmp.ne.s32.totalorder %s755_s7, %s751_s6 }
   0xa   : > { %p35_p4 = por %p34_p1, %p33_p0  ;;  %p40_p5 = scmp.eq.s32.totalorder %s802_s10, 0 }
   0xb   : > { %s818_s16 = scalar_select %p24_p2, %s759_s8, %s26_s13  }
   0xc   : > { %p820_p6 = por %p40_p5, %p39_p3  ;;  %p65_p7 = scmp.eq.s32.totalorder %s802_s10, 2 }
   0xd   : > { %p71_p8 = scmp.eq.s32.totalorder %s578_s11, 2  ;;  %p580_p11 = scmp.ge.s32.totalorder %s763_s9, 3 }
   0xe   : > { %p825_p9 = por %p65_p7, %p33_p0 }
   0xf   : > { %p829_p10 = por %p71_p8, %p39_p3  ;;  %87 = sbr.rel (%p580_p11) target bundleno = 61 (0x3d), region = 16 }
  0x14   : > { %90 = sbr.rel (!%p35_p4) target bundleno = 61 (0x3d), region = 20  ;;  %s91_s20 = sand.u32 (%p35_p4), 1, %s759_s8  }
  0x15   : > { %s582_s21 = sshll.u32 (%p35_p4), %s763_s9, 5  ;;  %s581_s22 = sshll.u32 (%p35_p4), %s91_s20, 9 }
  0x16   : > { %s583_s23 = sshll.u32 (%p35_p4), %s763_s9, 1  ;;  %s98_s24 = ssub.s32 (%p35_p4), 80, %s582_s21 }
  0x17   : > { %s102_s25 = ssub.s32 (%p35_p4), 5, %s583_s23  ;;  %p99_p12 = scmp.lt.s32.totalorder (%p35_p4), %s98_s24, 32 }
  0x18   : > { %p103_p13 = scmp.lt.s32.totalorder (%p35_p4), %s102_s25, 2  ;;  %s843_s30 = scalar_lea.sflag (%p35_p4), [#allocation3], %s91_s20 }
  0x19   : > { %s1181_s24 = smov (!%p99_p12, %s98_s24), 32  ;;  %s95_s2 = scalar_lea.vmem [#allocation2], %s581_s22 }
  0x1a   : > { %s1183_s25 = smov (!%p103_p13, %s102_s25), 2  ;;  %s584_s26 = sshll.u32 %s1181_s24, 3 }
  0x1b   : > { %s840_s27 = smul.u32 %s584_s26, %s1183_s25 }
  0x1d   : > { %s106_s28 = ssub.s32 512, %s840_s27 }
  0x1e   : > { %s107_s29 = sshll.u32 %s106_s28, 4 }
  0x1f   : > { %108 = vsyncadd %s843_s30, %s107_s29  ;;  %p585_p0 = scmp.ne.s32.totalorder %s840_s27, 0  ;;  %s602_s3 = smul.u32 160, %s763_s9 }
  0x20   : > { %s588_s4 = sshll.u32 %s1183_s25, 3  ;;  %s849_s5 = sshll.u32 %s95_s2, 4  ;;  %s119_s5 = int_to_ptr.vmem [resolvable:$true] %s849_s5 }
  0x21   : > { %s111_s11 = sadd.s32 %s602_s3, %s583_s23  ;;  %s853_s13 = smul.u32 %s588_s4, %s1181_s24 }
  0x22   : > { %s587_s14 = sshll.u32 %s111_s11, 3  ;;  %s658_s3 = scalar_lea.hbm %s1171_s0, 3200 }
  0x23   : > { %s113_s21 = scalar_lea.hbm %s1171_s0, %s587_s14  ;;  %s120_s22 = sshll.u32 %s853_s13, 4 }
  0x24   : > { %s116_s26 = sshll.u32 %s113_s21, 4  ;;  %s649_s23 = sshrl.u32 %s120_s22, 4  ;;  %s860_s26 = int_to_ptr.hbm [resolvable:$true] %s116_s26 }
  0x25   : > { %s647_s28 = sshra.s32 %s860_s26, 4  ;;  %s648_s28 = int_to_ptr.hbm [resolvable:$true] %s647_s28 }
  0x26   : > { %s654_s29 = scalar_lea.hbm %s648_s28, %s649_s23  ;;  %p659_p4 = scmp.lt.s32.totalorder %s648_s28, %s1171_s0 }
  0x27   : > { %p655_p1 = scmp.ne.s32.totalorder %s648_s28, %s654_s29  ;;  %p660_p5 = scmp.lt.s32.totalorder %s658_s3, %s654_s29 }
  0x29   : > { %p656_p2 = pnand %p655_p1, %p585_p0  ;;  %p661_p7 = por %p660_p5, %p659_p4 }
  0x2b   : > { %p657_p3 = pneg %p656_p2 }
  0x2d   : > { %p662_p8 = pnand %p661_p7, %p657_p3 }
  0x2f   : > { %665 = shalt.err (!%p662_p8)
}
  0x30   : > { %s666_s15 = sshra.s32 %s119_s5, 4  ;;  %s765_s21 = smov [#allocation2]   ;;  %s667_s15 = int_to_ptr.vmem [resolvable:$true] %s666_s15 }
  0x31   : > { %s673_s20 = scalar_lea.vmem %s667_s15, %s649_s23  ;;  %s677_s24 = scalar_lea.vmem %s765_s21, 1024 }
  0x32   : > { %p674_p11 = scmp.ne.s32.totalorder %s667_s15, %s673_s20  ;;  %p679_p1 = scmp.lt.s32.totalorder %s677_s24, %s673_s20 }
  0x34   : > { %p675_p12 = pnand %p674_p11, %p585_p0 }
  0x36   : > { %p676_p13 = pneg %p675_p12 }
  0x38   : > { %p681_p2 = pnand %p679_p1, %p676_p13 }
  0x3a   : > { %684 = shalt.err (!%p681_p2)
}
  0x3b   : > { %s766_s28 = smov 640   ;;  %s767_s29 = smov 256  }
  0x3c   : > { %124 = dma.hbm_to_vmem [thread:$0]  (%p585_p0), %s860_s26, %s120_s22, %s119_s5, %s843_s30, %s766_s28, %s767_s29, %s588_s4  }
  0x3d PF: > { %p589_p3 = scmp.ge.s32.totalorder %s763_s9, 1  ;;  %p126_p4 = scmp.lt.s32.totalorder %s763_s9, 4 }
  0x3f   : > { %p127_p5 = pnand %p589_p3, %p126_p4 }
  0x40   : > { %s890_s23 = sand.u32 (!%p127_p5), 1, %s755_s7  }
  0x41   : > { %130 = sbr.rel (%p127_p5) target bundleno = 171 (0xab), region = 24  ;;  %s590_s2 = sshll.u32 (!%p127_p5), %s890_s23, 9 }
  0x42   : > { %s133_s27 = scalar_lea.sflag (!%p127_p5), [#allocation3], %s890_s23  ;;  %s894_s25 = scalar_lea.vmem (!%p127_p5), [#allocation2], %s590_s2 }
  0x46   : > { %742 = dma.done.wait (%p820_p6), %s133_s27, 8192  }
  0x47   : > { %744 = vsyncadd (%p820_p6), %s133_s27, 4294959104  ;;  %v240_v0 = vlaneseq  ;;  %v176_v7 = vld [vmem:[%s894_s25] sm:$0xff]  ;;  %v177_v8 = vld [vmem:[%s894_s25 + $0x8] sm:$0xff]  ;;  %s915_s17 = scalar_lea.vmem [#allocation5], %s590_s2  ;;  %s469_s30 = scalar_lea.sflag [#allocation4], %s890_s23 }
  0x48   : > { %v178_v9 = vld [vmem:[%s894_s25 + $0x10] sm:$0xff]  ;;  %405 = vst [vmem:[%s915_s17 + $0x8] sm:$0xff] %v177_v8  ;;  %v179_v12 = vld [vmem:[%s894_s25 + $0x18] sm:$0xff]  ;;  %v180_v13 = vld [vmem:[%s894_s25 + $0x20] sm:$0xff]  ;;  %s593_s4 = sshll.u32 (%p825_p9), %s802_s10, 5  ;;  %s594_s5 = sshll.u32 (%p825_p9), %s802_s10, 1 }
  0x49   : > { %v900_v1 = vshrl.u32 %v240_v0, 7  ;;  %v902_v2 = vand.u32 127, %v240_v0  ;;  %v182_v16 = vld [vmem:[%s894_s25 + $0x30] sm:$0xff]  ;;  %v181_v17 = vld [vmem:[%s894_s25 + $0x28] sm:$0xff]  ;;  %v184_v18 = vld [vmem:[%s894_s25 + $0x40] sm:$0xff]  ;;  %407 = vst [vmem:[%s915_s17 + $0x18] sm:$0xff] %v179_v12 }
  0x4a   : > { %v183_v21 = vld [vmem:[%s894_s25 + $0x38] sm:$0xff]  ;;  %v186_v22 = vld [vmem:[%s894_s25 + $0x50] sm:$0xff]  ;;  %409 = vst [vmem:[%s915_s17 + $0x28] sm:$0xff] %v181_v17  ;;  %v185_v25 = vld [vmem:[%s894_s25 + $0x48] sm:$0xff]  ;;  %s478_s13 = ssub.s32 (%p825_p9), 80, %s593_s4  ;;  %s482_s22 = ssub.s32 (%p825_p9), 5, %s594_s5 }
  0x4b   : > { %v242_v3 = vadd.s32 8, %v900_v1  ;;  %v243_v4 = vadd.s32 16, %v900_v1  ;;  %v244_v5 = vadd.s32 24, %v900_v1  ;;  %vm276_vm0 = vcmp.eq.s32.totalorder %v900_v1, %v902_v2  ;;  %v188_v26 = vld [vmem:[%s894_s25 + $0x60] sm:$0xff]  ;;  %411 = vst [vmem:[%s915_s17 + $0x38] sm:$0xff] %v183_v21  ;;  %v187_v29 = vld [vmem:[%s894_s25 + $0x58] sm:$0xff] }
  0x4c   : > { %v245_v6 = vadd.s32 32, %v900_v1  ;;  %v340_v10 = vsel %vm276_vm0, 0.0, %v176_v7  ;;  %v246_v14 = vadd.s32 40, %v900_v1  ;;  %v247_v19 = vadd.s32 48, %v900_v1  ;;  %v190_v30 = vld [vmem:[%s894_s25 + $0x70] sm:$0xff]  ;;  %413 = vst [vmem:[%s915_s17 + $0x48] sm:$0xff] %v185_v25 }
  0x4d   : > { %vm278_vm1 = vcmp.eq.s32.totalorder %v242_v3, %v902_v2  ;;  %vm280_vm2 = vcmp.eq.s32.totalorder %v243_v4, %v902_v2  ;;  %vm282_vm3 = vcmp.eq.s32.totalorder %v244_v5, %v902_v2  ;;  %404 = vst [vmem:[%s915_s17] sm:$0xff] %v340_v10  ;;  %v248_v23 = vadd.s32 56, %v900_v1  ;;  %v189_v33 = vld [vmem:[%s894_s25 + $0x68] sm:$0xff]  ;;  %v192_v34 = vld [vmem:[%s894_s25 + $0x80] sm:$0xff]  ;;  %v191_v37 = vld [vmem:[%s894_s25 + $0x78] sm:$0xff]  ;;  %p479_p6 = scmp.lt.s32.totalorder (%p825_p9), %s478_s13, 32  ;;  %p483_p0 = scmp.lt.s32.totalorder (%p825_p9), %s482_s22, 2 }
  0x4e   : > { %v342_v11 = vsel %vm278_vm1, 0.0, %v178_v9  ;;  %v344_v15 = vsel %vm280_vm2, 0.0, %v180_v13  ;;  %vm284_vm4 = vcmp.eq.s32.totalorder %v245_v6, %v902_v2  ;;  %v346_v20 = vsel %vm282_vm3, 0.0, %v182_v16  ;;  %415 = vst [vmem:[%s915_s17 + $0x58] sm:$0xff] %v187_v29  ;;  %v194_v38 = vld [vmem:[%s894_s25 + $0x90] sm:$0xff]  ;;  %v193_v41 = vld [vmem:[%s894_s25 + $0x88] sm:$0xff] }
  0x4f   : > { %406 = vst [vmem:[%s915_s17 + $0x10] sm:$0xff] %v342_v11  ;;  %vm286_vm5 = vcmp.eq.s32.totalorder %v246_v14, %v902_v2  ;;  %v348_v24 = vsel %vm284_vm4, 0.0, %v184_v18  ;;  %vm288_vm6 = vcmp.eq.s32.totalorder %v247_v19, %v902_v2  ;;  %v249_v27 = vadd.s32 64, %v900_v1  ;;  %v196_v42 = vld [vmem:[%s894_s25 + $0xa0] sm:$0xff]  ;;  %v195_v45 = vld [vmem:[%s894_s25 + $0x98] sm:$0xff]  ;;  %v198_v46 = vld [vmem:[%s894_s25 + $0xb0] sm:$0xff] }
  0x50   : > { %408 = vst [vmem:[%s915_s17 + $0x20] sm:$0xff] %v344_v15  ;;  %v350_v28 = vsel %vm286_vm5, 0.0, %v186_v22  ;;  %vm290_vm7 = vcmp.eq.s32.totalorder %v248_v23, %v902_v2  ;;  %v250_v31 = vadd.s32 72, %v900_v1  ;;  %v352_v32 = vsel %vm288_vm6, 0.0, %v188_v26  ;;  %v197_v49 = vld [vmem:[%s894_s25 + $0xa8] sm:$0xff]  ;;  %v200_v50 = vld [vmem:[%s894_s25 + $0xc0] sm:$0xff] }
  0x51   : > { %410 = vst [vmem:[%s915_s17 + $0x30] sm:$0xff] %v346_v20  ;;  %vm292_vm8 = vcmp.eq.s32.totalorder %v249_v27, %v902_v2  ;;  %v251_v35 = vadd.s32 80, %v900_v1  ;;  %v354_v36 = vsel %vm290_vm7, 0.0, %v190_v30  ;;  %v252_v39 = vadd.s32 88, %v900_v1  ;;  %v199_v53 = vld [vmem:[%s894_s25 + $0xb8] sm:$0xff]  ;;  %v202_v54 = vld [vmem:[%s894_s25 + $0xd0] sm:$0xff] }
  0x52   : > { %412 = vst [vmem:[%s915_s17 + $0x40] sm:$0xff] %v348_v24  ;;  %vm294_vm9 = vcmp.eq.s32.totalorder %v250_v31, %v902_v2  ;;  %v356_v40 = vsel %vm292_vm8, 0.0, %v192_v34  ;;  %v253_v43 = vadd.s32 96, %v900_v1  ;;  %v254_v47 = vadd.s32 104, %v900_v1  ;;  %v201_v57 = vld [vmem:[%s894_s25 + $0xc8] sm:$0xff]  ;;  %v204_v58 = vld [vmem:[%s894_s25 + $0xe0] sm:$0xff] }
  0x53   : > { %414 = vst [vmem:[%s915_s17 + $0x50] sm:$0xff] %v350_v28  ;;  %vm296_vm10 = vcmp.eq.s32.totalorder %v251_v35, %v902_v2  ;;  %v358_v44 = vsel %vm294_vm9, 0.0, %v194_v38  ;;  %vm298_vm11 = vcmp.eq.s32.totalorder %v252_v39, %v902_v2  ;;  %v255_v51 = vadd.s32 112, %v900_v1  ;;  %v203_v62 = vld [vmem:[%s894_s25 + $0xd8] sm:$0xff]  ;;  %v206_v63 = vld [vmem:[%s894_s25 + $0xf0] sm:$0xff]  ;;  %v205_v4 = vld [vmem:[%s894_s25 + $0xe8] sm:$0xff] }
  0x54   : > { %416 = vst [vmem:[%s915_s17 + $0x60] sm:$0xff] %v352_v32  ;;  %v360_v48 = vsel %vm296_vm10, 0.0, %v196_v42  ;;  %vm300_vm12 = vcmp.eq.s32.totalorder %v253_v43, %v902_v2  ;;  %v362_v52 = vsel %vm298_vm11, 0.0, %v198_v46  ;;  %vm302_vm13 = vcmp.eq.s32.totalorder %v254_v47, %v902_v2  ;;  %v209_v6 = vld [vmem:[%s894_s25 + $0x108] sm:$0xff]  ;;  %v208_v8 = vld [vmem:[%s894_s25 + $0x100] sm:$0xff]  ;;  %v211_v9 = vld [vmem:[%s894_s25 + $0x118] sm:$0xff] }
  0x55   : > { %417 = vst [vmem:[%s915_s17 + $0x68] sm:$0xff] %v189_v33  ;;  %v256_v55 = vadd.s32 120, %v900_v1  ;;  %v364_v56 = vsel %vm300_vm12, 0.0, %v200_v50  ;;  %vm304_vm14 = vcmp.eq.s32.totalorder %v255_v51, %v902_v2  ;;  %v366_v59 = vsel %vm302_vm13, 0.0, %v202_v54  ;;  %v210_v12 = vld [vmem:[%s894_s25 + $0x110] sm:$0xff]  ;;  %v213_v13 = vld [vmem:[%s894_s25 + $0x128] sm:$0xff] }
  0x56   : > { %418 = vst [vmem:[%s915_s17 + $0x70] sm:$0xff] %v354_v36  ;;  %v257_v60 = vadd.s32 128, %v900_v1  ;;  %v991_v61 = vadd.s32 128, %v902_v2  ;;  %v368_v0 = vsel %vm304_vm14, 0.0, %v204_v58  ;;  %v258_v3 = vadd.s32 136, %v900_v1  ;;  %v212_v16 = vld [vmem:[%s894_s25 + $0x120] sm:$0xff] }
  0x57   : > { %419 = vst [vmem:[%s915_s17 + $0x78] sm:$0xff] %v191_v37  ;;  %vm306_vm15 = vcmp.eq.s32.totalorder %v256_v55, %v902_v2  ;;  %v259_v7 = vadd.s32 144, %v900_v1  ;;  %v207_v2 = vld [vmem:[%s894_s25 + $0xf8] sm:$0xff]  ;;  %v260_v10 = vadd.s32 152, %v900_v1  ;;  %v261_v14 = vadd.s32 160, %v900_v1  ;;  %v214_v20 = vld [vmem:[%s894_s25 + $0x130] sm:$0xff] }
  0x58   : > { %420 = vst [vmem:[%s915_s17 + $0x80] sm:$0xff] %v356_v40  ;;  %v370_v5 = vsel %vm306_vm15, 0.0, %v206_v63  ;;  %vm309_vm0 = vcmp.eq.s32.totalorder %v257_v60, %v991_v61  ;;  %vm311_vm1 = vcmp.eq.s32.totalorder %v258_v3, %v991_v61  ;;  %v215_v17 = vld [vmem:[%s894_s25 + $0x138] sm:$0xff]  ;;  %v262_v18 = vadd.s32 168, %v900_v1  ;;  %v217_v21 = vld [vmem:[%s894_s25 + $0x148] sm:$0xff]  ;;  %v216_v24 = vld [vmem:[%s894_s25 + $0x140] sm:$0xff] }
  0x59   : > { %421 = vst [vmem:[%s915_s17 + $0x88] sm:$0xff] %v193_v41  ;;  %v373_v11 = vsel %vm309_vm0, 0.0, %v209_v6  ;;  %vm313_vm2 = vcmp.eq.s32.totalorder %v259_v7, %v991_v61  ;;  %v375_v15 = vsel %vm311_vm1, 0.0, %v211_v9  ;;  %vm315_vm3 = vcmp.eq.s32.totalorder %v260_v10, %v991_v61  ;;  %v219_v25 = vld [vmem:[%s894_s25 + $0x158] sm:$0xff]  ;;  %v218_v28 = vld [vmem:[%s894_s25 + $0x150] sm:$0xff]  ;;  %v221_v29 = vld [vmem:[%s894_s25 + $0x168] sm:$0xff] }
  0x5a   : > { %422 = vst [vmem:[%s915_s17 + $0x90] sm:$0xff] %v358_v44  ;;  %v377_v19 = vsel %vm313_vm2, 0.0, %v213_v13  ;;  %vm317_vm4 = vcmp.eq.s32.totalorder %v261_v14, %v991_v61  ;;  %v263_v22 = vadd.s32 176, %v900_v1  ;;  %v379_v23 = vsel %vm315_vm3, 0.0, %v215_v17  ;;  %v220_v32 = vld [vmem:[%s894_s25 + $0x160] sm:$0xff]  ;;  %v223_v33 = vld [vmem:[%s894_s25 + $0x178] sm:$0xff] }
  0x5b   : > { %423 = vst [vmem:[%s915_s17 + $0x98] sm:$0xff] %v195_v45  ;;  %vm319_vm5 = vcmp.eq.s32.totalorder %v262_v18, %v991_v61  ;;  %v264_v26 = vadd.s32 184, %v900_v1  ;;  %v381_v27 = vsel %vm317_vm4, 0.0, %v217_v21  ;;  %v265_v30 = vadd.s32 192, %v900_v1  ;;  %v222_v36 = vld [vmem:[%s894_s25 + $0x170] sm:$0xff]  ;;  %v225_v37 = vld [vmem:[%s894_s25 + $0x188] sm:$0xff] }
  0x5c   : > { %424 = vst [vmem:[%s915_s17 + $0xa0] sm:$0xff] %v360_v48  ;;  %vm321_vm6 = vcmp.eq.s32.totalorder %v263_v22, %v991_v61  ;;  %v383_v31 = vsel %vm319_vm5, 0.0, %v219_v25  ;;  %v266_v34 = vadd.s32 200, %v900_v1  ;;  %v267_v38 = vadd.s32 208, %v900_v1  ;;  %v224_v40 = vld [vmem:[%s894_s25 + $0x180] sm:$0xff]  ;;  %v227_v41 = vld [vmem:[%s894_s25 + $0x198] sm:$0xff] }
  0x5d   : > { %425 = vst [vmem:[%s915_s17 + $0xa8] sm:$0xff] %v197_v49  ;;  %vm323_vm7 = vcmp.eq.s32.totalorder %v264_v26, %v991_v61  ;;  %v385_v35 = vsel %vm321_vm6, 0.0, %v221_v29  ;;  %vm325_vm8 = vcmp.eq.s32.totalorder %v265_v30, %v991_v61  ;;  %v268_v42 = vadd.s32 216, %v900_v1  ;;  %v226_v44 = vld [vmem:[%s894_s25 + $0x190] sm:$0xff]  ;;  %v229_v45 = vld [vmem:[%s894_s25 + $0x1a8] sm:$0xff]  ;;  %v228_v48 = vld [vmem:[%s894_s25 + $0x1a0] sm:$0xff] }
  0x5e   : > { %426 = vst [vmem:[%s915_s17 + $0xb0] sm:$0xff] %v362_v52  ;;  %v387_v39 = vsel %vm323_vm7, 0.0, %v223_v33  ;;  %vm327_vm9 = vcmp.eq.s32.totalorder %v266_v34, %v991_v61  ;;  %v389_v43 = vsel %vm325_vm8, 0.0, %v225_v37  ;;  %vm329_vm10 = vcmp.eq.s32.totalorder %v267_v38, %v991_v61  ;;  %v231_v49 = vld [vmem:[%s894_s25 + $0x1b8] sm:$0xff]  ;;  %v230_v52 = vld [vmem:[%s894_s25 + $0x1b0] sm:$0xff] }
  0x5f   : > { %427 = vst [vmem:[%s915_s17 + $0xb8] sm:$0xff] %v199_v53  ;;  %v269_v46 = vadd.s32 224, %v900_v1  ;;  %v391_v47 = vsel %vm327_vm9, 0.0, %v227_v41  ;;  %vm331_vm11 = vcmp.eq.s32.totalorder %v268_v42, %v991_v61  ;;  %v270_v50 = vadd.s32 232, %v900_v1  ;;  %v233_v53 = vld [vmem:[%s894_s25 + $0x1c8] sm:$0xff]  ;;  %v234_v60 = vld [vmem:[%s894_s25 + $0x1d0] sm:$0xff] }
  0x60   : > { %428 = vst [vmem:[%s915_s17 + $0xc0] sm:$0xff] %v364_v56  ;;  %v393_v51 = vsel %vm329_vm10, 0.0, %v229_v45  ;;  %v271_v54 = vadd.s32 240, %v900_v1  ;;  %v395_v55 = vsel %vm331_vm11, 0.0, %v231_v49  ;;  %v232_v56 = vld [vmem:[%s894_s25 + $0x1c0] sm:$0xff]  ;;  %v272_v58 = vadd.s32 248, %v900_v1 }
  0x61   : > { %429 = vst [vmem:[%s915_s17 + $0xc8] sm:$0xff] %v201_v57  ;;  %vm333_vm12 = vcmp.eq.s32.totalorder %v269_v46, %v991_v61  ;;  %v235_v57 = vld [vmem:[%s894_s25 + $0x1d8] sm:$0xff]  ;;  %vm335_vm13 = vcmp.eq.s32.totalorder %v270_v50, %v991_v61 }
  0x62   : > { %430 = vst [vmem:[%s915_s17 + $0xd0] sm:$0xff] %v366_v59  ;;  %v397_v59 = vsel %vm333_vm12, 0.0, %v233_v53  ;;  %vm337_vm14 = vcmp.eq.s32.totalorder %v271_v54, %v991_v61  ;;  %v399_v63 = vsel %vm335_vm13, 0.0, %v235_v57  ;;  %v239_v3 = vld [vmem:[%s894_s25 + $0x1f8] sm:$0xff]  ;;  %vm339_vm15 = vcmp.eq.s32.totalorder %v272_v58, %v991_v61 }
  0x63   : > { %431 = vst [vmem:[%s915_s17 + $0xd8] sm:$0xff] %v203_v62  ;;  %v237_v62 = vld [vmem:[%s894_s25 + $0x1e8] sm:$0xff] }
  0x64   : > { %432 = vst [vmem:[%s915_s17 + $0xe0] sm:$0xff] %v368_v0  ;;  %v236_v0 = vld [vmem:[%s894_s25 + $0x1e0] sm:$0xff]  ;;  %v401_v1 = vsel %vm337_vm14, 0.0, %v237_v62 }
  0x65   : > { %433 = vst [vmem:[%s915_s17 + $0xe8] sm:$0xff] %v205_v4  ;;  %v238_v4 = vld [vmem:[%s894_s25 + $0x1f0] sm:$0xff] }
  0x66   : > { %434 = vst [vmem:[%s915_s17 + $0xf0] sm:$0xff] %v370_v5  ;;  %v403_v5 = vsel %vm339_vm15, 0.0, %v239_v3 }
  0x67   : > { %435 = vst [vmem:[%s915_s17 + $0xf8] sm:$0xff] %v207_v2 }
  0x68   : > { %436 = vst [vmem:[%s915_s17 + $0x100] sm:$0xff] %v208_v8 }
  0x69   : > { %437 = vst [vmem:[%s915_s17 + $0x108] sm:$0xff] %v373_v11 }
  0x6a   : > { %438 = vst [vmem:[%s915_s17 + $0x110] sm:$0xff] %v210_v12 }
  0x6b   : > { %439 = vst [vmem:[%s915_s17 + $0x118] sm:$0xff] %v375_v15 }
  0x6c   : > { %440 = vst [vmem:[%s915_s17 + $0x120] sm:$0xff] %v212_v16 }
  0x6d   : > { %441 = vst [vmem:[%s915_s17 + $0x128] sm:$0xff] %v377_v19 }
  0x6e   : > { %442 = vst [vmem:[%s915_s17 + $0x130] sm:$0xff] %v214_v20 }
  0x6f   : > { %443 = vst [vmem:[%s915_s17 + $0x138] sm:$0xff] %v379_v23 }
  0x70   : > { %444 = vst [vmem:[%s915_s17 + $0x140] sm:$0xff] %v216_v24 }
  0x71   : > { %445 = vst [vmem:[%s915_s17 + $0x148] sm:$0xff] %v381_v27 }
  0x72   : > { %446 = vst [vmem:[%s915_s17 + $0x150] sm:$0xff] %v218_v28 }
  0x73   : > { %447 = vst [vmem:[%s915_s17 + $0x158] sm:$0xff] %v383_v31 }
  0x74   : > { %448 = vst [vmem:[%s915_s17 + $0x160] sm:$0xff] %v220_v32 }
  0x75   : > { %449 = vst [vmem:[%s915_s17 + $0x168] sm:$0xff] %v385_v35 }
  0x76   : > { %450 = vst [vmem:[%s915_s17 + $0x170] sm:$0xff] %v222_v36 }
  0x77   : > { %451 = vst [vmem:[%s915_s17 + $0x178] sm:$0xff] %v387_v39 }
  0x78   : > { %452 = vst [vmem:[%s915_s17 + $0x180] sm:$0xff] %v224_v40 }
  0x79   : > { %453 = vst [vmem:[%s915_s17 + $0x188] sm:$0xff] %v389_v43 }
  0x7a   : > { %454 = vst [vmem:[%s915_s17 + $0x190] sm:$0xff] %v226_v44 }
  0x7b   : > { %455 = vst [vmem:[%s915_s17 + $0x198] sm:$0xff] %v391_v47 }
  0x7c   : > { %456 = vst [vmem:[%s915_s17 + $0x1a0] sm:$0xff] %v228_v48 }
  0x7d   : > { %457 = vst [vmem:[%s915_s17 + $0x1a8] sm:$0xff] %v393_v51 }
  0x7e   : > { %458 = vst [vmem:[%s915_s17 + $0x1b0] sm:$0xff] %v230_v52 }
  0x7f   : > { %459 = vst [vmem:[%s915_s17 + $0x1b8] sm:$0xff] %v395_v55 }
  0x80   : > { %460 = vst [vmem:[%s915_s17 + $0x1c0] sm:$0xff] %v232_v56 }
  0x81   : > { %461 = vst [vmem:[%s915_s17 + $0x1c8] sm:$0xff] %v397_v59 }
  0x82   : > { %462 = vst [vmem:[%s915_s17 + $0x1d0] sm:$0xff] %v234_v60 }
  0x83   : > { %463 = vst [vmem:[%s915_s17 + $0x1d8] sm:$0xff] %v399_v63  ;;  %475 = sbr.rel (!%p825_p9) target bundleno = 171 (0xab), region = 32 }
  0x84   : > { %464 = vst [vmem:[%s915_s17 + $0x1e0] sm:$0xff] %v236_v0 }
  0x85   : > { %465 = vst [vmem:[%s915_s17 + $0x1e8] sm:$0xff] %v401_v1 }
  0x86   : > { %466 = vst [vmem:[%s915_s17 + $0x1f0] sm:$0xff] %v238_v4 }
  0x87   : > { %467 = vst [vmem:[%s915_s17 + $0x1f8] sm:$0xff] %v403_v5 }
  0x88   : > { %s1185_s13 = smov (!%p479_p6, %s478_s13), 32  ;;  %s1187_s22 = smov (!%p483_p0, %s482_s22), 2 }
  0x89   : > { %s595_s26 = sshll.u32 %s1185_s13, 3 }
  0x8a   : > { %s1109_s3 = smul.u32 %s595_s26, %s1187_s22 }
  0x8c   : > { %s486_s11 = ssub.s32 512, %s1109_s3 }
  0x8d   : > { %s487_s18 = sshll.u32 %s486_s11, 4 }
  0x8e   : > { %488 = vsyncadd %s469_s30, %s487_s18  ;;  %p596_p9 = scmp.ne.s32.totalorder %s1109_s3, 0  ;;  %s603_s14 = smul.u32 160, %s802_s10 }
  0x8f   : > { %s599_s15 = sshll.u32 %s1187_s22, 3  ;;  %s496_s20 = sshll.u32 %s915_s17, 4  ;;  %s1122_s20 = int_to_ptr.vmem [resolvable:$true] %s496_s20 }
  0x90   : > { %s491_s21 = sadd.s32 %s603_s14, %s594_s5  ;;  %s1120_s24 = smul.u32 %s599_s15, %s1185_s13 }
  0x91   : > { %s598_s28 = sshll.u32 %s491_s21, 3  ;;  %s686_s10 = sshra.s32 %s1122_s20, 4  ;;  %s687_s10 = int_to_ptr.vmem [resolvable:$true] %s686_s10 }
  0x92   : > { %s493_s27 = scalar_lea.hbm %s1172_s1, %s598_s28  ;;  %s500_s25 = sshll.u32 %s1120_s24, 4 }
  0x93   : > { %s498_s4 = sshll.u32 %s493_s27, 4  ;;  %s688_s17 = sshrl.u32 %s500_s25, 4  ;;  %s1128_s4 = int_to_ptr.hbm [resolvable:$true] %s498_s4 }
  0x94   : > { %s693_s5 = scalar_lea.vmem %s687_s10, %s688_s17  ;;  %s768_s13 = smov [#allocation5]  }
  0x95   : > { %p694_p7 = scmp.ne.s32.totalorder %s687_s10, %s693_s5  ;;  %s697_s26 = scalar_lea.vmem %s768_s13, 1024 }
  0x96   : > { %p699_p12 = scmp.lt.s32.totalorder %s697_s26, %s693_s5 }
  0x97   : > { %p695_p8 = pnand %p694_p7, %p596_p9 }
  0x99   : > { %p696_p11 = pneg %p695_p8 }
  0x9b   : > { %p701_p13 = pnand %p699_p12, %p696_p11 }
  0x9d   : > { %704 = shalt.err (!%p701_p13)
}
  0x9e   : > { %s705_s11 = sshra.s32 %s1128_s4, 4  ;;  %s716_s28 = scalar_lea.hbm %s1172_s1, 3200  ;;  %s706_s11 = int_to_ptr.hbm [resolvable:$true] %s705_s11 }
  0x9f   : > { %s712_s18 = scalar_lea.hbm %s706_s11, %s688_s17  ;;  %p717_p4 = scmp.lt.s32.totalorder %s706_s11, %s1172_s1 }
  0xa0   : > { %p713_p1 = scmp.ne.s32.totalorder %s706_s11, %s712_s18  ;;  %p718_p5 = scmp.lt.s32.totalorder %s716_s28, %s712_s18 }
  0xa2   : > { %p714_p2 = pnand %p713_p1, %p596_p9  ;;  %p719_p6 = por %p718_p5, %p717_p4 }
  0xa4   : > { %p715_p3 = pneg %p714_p2 }
  0xa6   : > { %p720_p0 = pnand %p719_p6, %p715_p3 }
  0xa8   : > { %723 = shalt.err (!%p720_p0)
}
  0xa9   : > { %s769_s27 = smov 256   ;;  %s770_s10 = smov 640  }
  0xaa   : > { %504 = dma.vmem_to_hbm [thread:$0]  (%p596_p9), %s1122_s20, %s500_s25, %s1128_s4, %s469_s30, %s769_s27, %s770_s10, %s599_s15  }
  0xab PF: > { %p610_p7 = scmp.ge.s32.totalorder %s763_s9, 2  ;;  %s513_s17 = sand.u32 1, %s751_s6  }
  0xac   : > { %s514_s5 = scalar_lea.sflag [#allocation4], %s513_s17 }
  0xad   : > { %p607_p8 = pnand %p610_p7, %p829_p10 }
  0xaf   : > { %p608_p11 = pneg %p607_p8 }
  0xb1   : > { %746 = dma.done.wait (%p608_p11), %s514_s5, 8192  }
  0xb2   : > { %748 = vsyncadd (%p608_p11), %s514_s5, 4294959104  ;;  %p14_p12 = scmp.ge.s32.totalorder %s806_s12, 5   ;;  %s1176_s6 = smov %s755_s7 }
  0xb3   : > { %s1177_s7 = smov %s759_s8  ;;  %s1178_s8 = smov %s818_s16 }
  0xb4   : > { %s1179_s9 = smov %s806_s12  ;;  %16 = sbr.rel (!%p14_p12) target bundleno = 5 (0x5), region = 69 }
  0xb9   :  { %520 = vsyncpa [#allocation3], 1 }
  0xba   :  { %522 = vsyncpa [#allocation3 + $0x1], 1 }
  0xbb   :  { %523 = vsyncpa [#allocation4], 1 }
  0xbc   :  { %525 = vsyncpa [#allocation4 + $0x1], 1 }

</bundles_post_ra>
